<compile_context>
chip_gen: v7x
topology: tpu7x:2x2x1
jax: 0.10.0
libtpu: 0.0.40
codegen_flags: <defaults>
</compile_context>

<pallas_src>
import functools

import jax
import jax.numpy as jnp
from jax.experimental import pallas as pl
from jax.experimental.pallas import tpu as pltpu

H = 200          # hidden units in the PyTorch module
H_PAD = 256      # padded hidden width; unit H is a constant-1 bias carrier
K_PAD = 8        # padded layer-1 contraction depth: [state (S) | 1 | zeros]
OUT_ROWS = 8     # fused head output rows: [mean (A) | std (A) | zero pad]


def _softplus(x):
    # numerically stable softplus; matches F.softplus (threshold=20) to ~2e-9
    return jnp.where(x > 20.0, x, jnp.log1p(jnp.exp(jnp.minimum(x, 20.0))))


def _actor_kernel(x_ref, w1_ref, wh_ref, out_ref, *, action_shape):
    # Transposed layout, batch on lanes:
    #   x_ref  : (K_PAD, TB)       augmented state  [s_0..s_{S-1}; 1; 0...]
    #   w1_ref : (H_PAD, K_PAD)    [W1 | b1] rows; constant-1 unit at row H
    #   wh_ref : (OUT_ROWS, H_PAD) fused [Wm; Ws] head; biases in column H
    #   out_ref: (OUT_ROWS, TB)    rows [mean | std | pad], lane-dense store
    h = jnp.maximum(
        jnp.dot(w1_ref[...], x_ref[...], preferred_element_type=jnp.float32), 0.0)
    z = jnp.dot(wh_ref[...], h, preferred_element_type=jnp.float32)   # (8, TB)
    row = jax.lax.broadcasted_iota(jnp.int32, z.shape, dimension=0)
    out_ref[...] = jnp.where(row < action_shape, jnp.tanh(z), _softplus(z) + 1e-8)


def _round_up(x, m):
    return ((x + m - 1) // m) * m


def _pick_tiles(batch, max_batch_tile):
    """Return (tb, b_pad): lane tile (multiple of 128) and padded batch."""
    b128 = _round_up(max(batch, 1), 128)
    if b128 <= 128:
        return 128, 128
    # Aim for >= 2 grid steps so both v7x TensorCores get work (the batch grid
    # axis is marked "parallel"), capped by max_batch_tile.
    tb = min(max_batch_tile, _round_up((b128 + 1) // 2, 128))
    return tb, _round_up(b128, tb)


def prepare_params(p):
    """Host-side, one time: transpose, fuse heads, fold biases, zero-pad."""
    S = p["w1"].shape[0]
    A = p["wm"].shape[1]
    assert S + 1 <= K_PAD, "state_shape too large for K_PAD"
    assert H < H_PAD, "need one padded hidden unit as bias carrier"
    assert 2 * A <= OUT_ROWS, "action_shape too large for fused output rows"

    # Layer 1 (transposed): columns 0..S-1 = W1^T, column S = b1.
    # Row H is a constant-1 unit (weight 1 on the constant-1 input row).
    w1a = jnp.zeros((H_PAD, K_PAD), jnp.float32)
    w1a = w1a.at[:H, :S].set(p["w1"].T)
    w1a = w1a.at[:H, S].set(p["b1"][0])
    w1a = w1a.at[H, S].set(1.0)

    # Fused head (transposed): rows 0..A-1 = mean, rows A..2A-1 = std,
    # column H (constant-1 hidden unit) carries the head biases.
    wh = jnp.zeros((OUT_ROWS, H_PAD), jnp.float32)
    wh = wh.at[:A, :H].set(p["wm"].T)
    wh = wh.at[A:2 * A, :H].set(p["ws"].T)
    wh = wh.at[:A, H].set(p["bm"][0])
    wh = wh.at[A:2 * A, H].set(p["bs"][0])

    return dict(w1a=w1a, wh=wh, action_shape=A, state_shape=S)


def actor_forward(state, padded, *, max_batch_tile=1024):
    """state: (B, S).  padded: output of prepare_params.  Returns (mean, std)."""
    state = jnp.asarray(state, jnp.float32)
    B, S = state.shape
    A = padded["action_shape"]
    assert S == padded["state_shape"]

    tb, b_pad = _pick_tiles(B, max_batch_tile)

    # Augmented, transposed input: rows 0..S-1 = state^T, row S = 1 (bias
    # carrier), remaining rows / padded batch columns = 0.
    x_aug = jnp.zeros((K_PAD, b_pad), jnp.float32)
    x_aug = x_aug.at[:S, :B].set(state.T)
    x_aug = x_aug.at[S, :].set(1.0)

    kernel = functools.partial(_actor_kernel, action_shape=A)
    out = pl.pallas_call(
        kernel,
        out_shape=jax.ShapeDtypeStruct((OUT_ROWS, b_pad), jnp.float32),
        grid=(b_pad // tb,),
        in_specs=[
            pl.BlockSpec((K_PAD, tb), lambda i: (0, i)),         # state tile
            pl.BlockSpec((H_PAD, K_PAD), lambda i: (0, 0)),      # layer-1 weight (resident)
            pl.BlockSpec((OUT_ROWS, H_PAD), lambda i: (0, 0)),   # fused head weight (resident)
        ],
        out_specs=pl.BlockSpec((OUT_ROWS, tb), lambda i: (0, i)),
        compiler_params=pltpu.CompilerParams(
            dimension_semantics=("parallel",)),                  # shard batch tiles on v7x
    )(x_aug, padded["w1a"], padded["wh"])

    mean = out[:A, :B].T
    std = out[A:2 * A, :B].T
    return mean, std


def init_params(key, state_shape, hidden, action_shape):
    """PyTorch-style init; weights stored as (in_features, out_features)."""
    ks = jax.random.split(key, 6)

    def lin(kw, kb, fan_in, fan_out):
        bound = 1.0 / jnp.sqrt(fan_in)
        w = jax.random.uniform(kw, (fan_in, fan_out), jnp.float32, -bound, bound)
        b = jax.random.uniform(kb, (1, fan_out), jnp.float32, -bound, bound)
        return w, b

    w1, b1 = lin(ks[0], ks[1], state_shape, hidden)
    wm, bm = lin(ks[2], ks[3], hidden, action_shape)
    ws, bs = lin(ks[4], ks[5], hidden, action_shape)
    return dict(w1=w1, b1=b1, wm=wm, bm=bm, ws=ws, bs=bs)


def reference_forward(state, p):
    h = jnp.maximum(state @ p["w1"] + p["b1"], 0.0)
    mean = jnp.tanh(h @ p["wm"] + p["bm"])
    std = jax.nn.softplus(h @ p["ws"] + p["bs"]) + 1e-8
    return mean, std


if __name__ == "__main__":
    # MountainCarContinuous-v0: observation dim = 2, action dim = 1
    STATE_SHAPE, HIDDEN, ACTION_SHAPE = 2, 200, 1

    key = jax.random.PRNGKey(0)
    kp, kx1, kx2 = jax.random.split(key, 3)
    params = init_params(kp, STATE_SHAPE, HIDDEN, ACTION_SHAPE)
    padded = prepare_params(params)   # one-time host-side fuse/transpose/pad

    # Small RL-style batch (single grid step).
    B1 = 8
    state1 = jax.random.normal(kx1, (B1, STATE_SHAPE), jnp.float32)
    mean1, std1 = actor_forward(state1, padded)
    jax.block_until_ready((mean1, std1))
    ref_m1, ref_s1 = reference_forward(state1, params)
    assert mean1.shape == (B1, ACTION_SHAPE) and std1.shape == (B1, ACTION_SHAPE)
    assert jnp.allclose(mean1, ref_m1, atol=1e-5, rtol=1e-5)
    assert jnp.allclose(std1, ref_s1, atol=1e-5, rtol=1e-5)
    assert bool(jnp.all(std1 > 0))

    # Larger, non-aligned batch: exercises padding and the 2-step parallel grid.
    B2 = 300
    state2 = jax.random.normal(kx2, (B2, STATE_SHAPE), jnp.float32)
    mean2, std2 = actor_forward(state2, padded)
    jax.block_until_ready((mean2, std2))
    ref_m2, ref_s2 = reference_forward(state2, params)
    assert mean2.shape == (B2, ACTION_SHAPE) and std2.shape == (B2, ACTION_SHAPE)
    assert jnp.allclose(mean2, ref_m2, atol=1e-5, rtol=1e-5)
    assert jnp.allclose(std2, ref_s2, atol=1e-5, rtol=1e-5)
    assert bool(jnp.all(std2 > 0))

    print("KERNEL_OK")
</pallas_src>

<mosaic_0001>
module attributes {stable_mosaic.version = 11 : i64} {
  func.func @_actor_kernel(%arg0: i32, %arg1: memref<8x128xf32, #tpu.memory_space<vmem>>, %arg2: memref<256x8xf32, #tpu.memory_space<vmem>>, %arg3: memref<8x256xf32, #tpu.memory_space<vmem>>, %arg4: memref<8x128xf32, #tpu.memory_space<vmem>>) attributes {dimension_semantics = [#tpu.dimension_semantics<parallel>], iteration_bounds = array<i64: 1>, scalar_prefetch = 0 : i64, scratch_operands = 0 : i64, tpu.core_type = #tpu.core_type<tc>, window_params = [{transform_indices = @transform_0, window_bounds = array<i64: 8, 128>}, {pipeline_mode = #tpu.pipeline_mode<synchronous>, transform_indices = @transform_1, window_bounds = array<i64: 256, 8>}, {pipeline_mode = #tpu.pipeline_mode<synchronous>, transform_indices = @transform_2, window_bounds = array<i64: 8, 256>}, {transform_indices = @transform_3, window_bounds = array<i64: 8, 128>}]} {
    %c0 = arith.constant 0 : index
    %c0_0 = arith.constant 0 : index
    %0 = vector.load %arg2[%c0, %c0_0] : memref<256x8xf32, #tpu.memory_space<vmem>>, vector<256x8xf32>
    %c0_1 = arith.constant 0 : index
    %c0_2 = arith.constant 0 : index
    %1 = vector.load %arg1[%c0_1, %c0_2] : memref<8x128xf32, #tpu.memory_space<vmem>>, vector<8x128xf32>
    %cst = arith.constant dense<0.000000e+00> : vector<256x128xf32>
    %2 = tpu.matmul %0, %1, %cst {dimension_numbers = #tpu.dot_dimension_numbers<[1], [0], [0], [1], [0, 0, 1, 1], [], []>} : vector<256x8xf32>, vector<8x128xf32>, vector<256x128xf32> -> vector<256x128xf32>
    %cst_3 = arith.constant 0.000000e+00 : f32
    %3 = vector.broadcast %cst_3 : f32 to vector<256x128xf32>
    %4 = arith.maximumf %2, %3 : vector<256x128xf32>
    %c0_4 = arith.constant 0 : index
    %c0_5 = arith.constant 0 : index
    %5 = vector.load %arg3[%c0_4, %c0_5] : memref<8x256xf32, #tpu.memory_space<vmem>>, vector<8x256xf32>
    %cst_6 = arith.constant dense<0.000000e+00> : vector<8x128xf32>
    %6 = tpu.matmul %5, %4, %cst_6 {dimension_numbers = #tpu.dot_dimension_numbers<[1], [0], [0], [1], [0, 0, 1, 1], [], []>} : vector<8x256xf32>, vector<256x128xf32>, vector<8x128xf32> -> vector<8x128xf32>
    %7 = tpu.iota {dimensions = array<i32: 0>} : vector<8x128xi32>
    %c1_i32 = arith.constant 1 : i32
    %8 = vector.broadcast %c1_i32 : i32 to vector<8x128xi32>
    %9 = arith.cmpi slt, %7, %8 : vector<8x128xi32>
    %10 = math.tanh %6 : vector<8x128xf32>
    %cst_7 = arith.constant 2.000000e+01 : f32
    %11 = vector.broadcast %cst_7 : f32 to vector<8x128xf32>
    %12 = arith.cmpf ogt, %6, %11 : vector<8x128xf32>
    %cst_8 = arith.constant 2.000000e+01 : f32
    %13 = vector.broadcast %cst_8 : f32 to vector<8x128xf32>
    %14 = arith.minimumf %6, %13 : vector<8x128xf32>
    %15 = math.exp %14 : vector<8x128xf32>
    %16 = math.log1p %15 : vector<8x128xf32>
    %17 = arith.select %12, %6, %16 : vector<8x128xi1>, vector<8x128xf32>
    %cst_9 = arith.constant 9.99999993E-9 : f32
    %18 = vector.broadcast %cst_9 : f32 to vector<8x128xf32>
    %19 = arith.addf %17, %18 : vector<8x128xf32>
    %20 = arith.select %9, %10, %19 : vector<8x128xi1>, vector<8x128xf32>
    %c0_10 = arith.constant 0 : index
    %c0_11 = arith.constant 0 : index
    %21 = vector.load %arg4[%c0_10, %c0_11] : memref<8x128xf32, #tpu.memory_space<vmem>>, vector<8x128xf32>
    tpu.vector_store %arg4[%c0_10, %c0_11], %20 {strides = array<i32>} : memref<8x128xf32, #tpu.memory_space<vmem>>, vector<8x128xf32>,
    return
  }
  func.func @transform_0(%arg0: i32) -> (i32, i32) {
    %c0_i32 = arith.constant 0 : i32
    %c0_i32_0 = arith.constant 0 : i32
    return %c0_i32, %arg0 : i32, i32
  }
  func.func @transform_1(%arg0: i32) -> (i32, i32) {
    %c0_i32 = arith.constant 0 : i32
    %c0_i32_0 = arith.constant 0 : i32
    %c0_i32_1 = arith.constant 0 : i32
    return %c0_i32, %c0_i32_0 : i32, i32
  }
  func.func @transform_2(%arg0: i32) -> (i32, i32) {
    %c0_i32 = arith.constant 0 : i32
    %c0_i32_0 = arith.constant 0 : i32
    %c0_i32_1 = arith.constant 0 : i32
    return %c0_i32, %c0_i32_0 : i32, i32
  }
  func.func @transform_3(%arg0: i32) -> (i32, i32) {
    %c0_i32 = arith.constant 0 : i32
    %c0_i32_0 = arith.constant 0 : i32
    return %c0_i32, %arg0 : i32, i32
  }
}

</mosaic_0001>

<bundles_post_ra>
// kernel: tpu_custom_call.1
= control target key start
LH: loop header
LB: loop body
LE: loop exit
PB: predicated region body
PF: predicated region fallthrough
CT: control target
= control target key end

     0   :  { %vm48_vm0 = vcmask 64512   ;;  %s892_s0 = inlined_call_operand.vmem [shape: f32[8,128], index: 0, kind: input, shape index: {}]   ;;  %s893_s1 = inlined_call_operand.vmem [shape: f32[256,8], index: 1, kind: input, shape index: {}]   ;;  %s894_s2 = inlined_call_operand.vmem [shape: f32[8,256], index: 2, kind: input, shape index: {}]   ;;  %s895_s3 = inlined_call_operand.hbm [shape: f32[8,128], index: 3, kind: output, shape index: {}]  }
   0x1   :  { %v47_v0 = vld [vmem:[%s892_s0] sm:$0xff]  ;;  %v16_v2 = vld [vmem:[%s893_s1 + $0x8] sm:$0xff]  ;;  %v17_v3 = vld [vmem:[%s893_s1 + $0x10] sm:$0xff] }
   0x2   :  { %v15_v1 = vld [vmem:[%s893_s1] sm:$0xff]  ;;  %609 = vmatprep.subr.mxu0 %v47_v0  ;;  %v18_v4 = vld [vmem:[%s893_s1 + $0x18] sm:$0xff]  ;;  %v20_v6 = vld [vmem:[%s893_s1 + $0x28] sm:$0xff] }
   0x3   :  { %611 = vmatprep.mubr.msk.f32.mxu0 %vm48_vm0, %v15_v1  ;;  %610 = vmatpush3.msra.mxu0 %v47_v0  ;;  %v19_v5 = vld [vmem:[%s893_s1 + $0x20] sm:$0xff]  ;;  %v21_v7 = vld [vmem:[%s893_s1 + $0x30] sm:$0xff] }
   0x4   :  { %612 = vmatmul.mubr.msk.f32.vlgmr.msra.gmra.mrb[0].mxu0 %vm48_vm0, %v16_v2 }
   0x5   :  { %614 = vmatprep.mubr.msk.f32.mxu0 %vm48_vm0, %v17_v3 }
   0x8   :  { %615 = vmatmul.mubr.msk.f32.gmra.mrb[2].mxu0 %vm48_vm0, %v18_v4 }
   0x9   :  { %617 = vmatprep.mubr.msk.f32.mxu0 %vm48_vm0, %v19_v5 }
   0xc   :  { %618 = vmatmul.mubr.msk.f32.gmra.mrb[4].mxu0 %vm48_vm0, %v20_v6 }
   0xd   :  { %8 = vsyncpa [#allocation3], 0  ;;  %620 = vmatprep.mubr.msk.f32.mxu0 %vm48_vm0, %v21_v7  ;;  %v22_v8 = vld [vmem:[%s893_s1 + $0x38] sm:$0xff]  ;;  %v23_v9 = vld [vmem:[%s893_s1 + $0x40] sm:$0xff] }
   0xe   :  { %v24_v10 = vld [vmem:[%s893_s1 + $0x48] sm:$0xff]  ;;  %v25_v11 = vld [vmem:[%s893_s1 + $0x50] sm:$0xff]  ;;  %v26_v12 = vld [vmem:[%s893_s1 + $0x58] sm:$0xff] }
   0xf   :  { %v27_v13 = vld [vmem:[%s893_s1 + $0x60] sm:$0xff]  ;;  %v28_v14 = vld [vmem:[%s893_s1 + $0x68] sm:$0xff]  ;;  %v29_v15 = vld [vmem:[%s893_s1 + $0x70] sm:$0xff] }
  0x10   :  { %621 = vmatmul.mubr.msk.f32.gmra.mrb[6].mxu0 %vm48_vm0, %v22_v8  ;;  %v30_v16 = vld [vmem:[%s893_s1 + $0x78] sm:$0xff]  ;;  %v31_v17 = vld [vmem:[%s893_s1 + $0x80] sm:$0xff]  ;;  %v32_v18 = vld [vmem:[%s893_s1 + $0x88] sm:$0xff] }
  0x11   :  { %623 = vmatprep.mubr.msk.f32.mxu0 %vm48_vm0, %v23_v9  ;;  %v33_v19 = vld [vmem:[%s893_s1 + $0x90] sm:$0xff]  ;;  %v34_v20 = vld [vmem:[%s893_s1 + $0x98] sm:$0xff]  ;;  %v35_v21 = vld [vmem:[%s893_s1 + $0xa0] sm:$0xff] }
  0x12   :  { %v36_v22 = vld [vmem:[%s893_s1 + $0xa8] sm:$0xff]  ;;  %v37_v23 = vld [vmem:[%s893_s1 + $0xb0] sm:$0xff]  ;;  %v38_v24 = vld [vmem:[%s893_s1 + $0xb8] sm:$0xff] }
  0x13   :  { %v39_v25 = vld [vmem:[%s893_s1 + $0xc0] sm:$0xff]  ;;  %v40_v26 = vld [vmem:[%s893_s1 + $0xc8] sm:$0xff]  ;;  %v41_v27 = vld [vmem:[%s893_s1 + $0xd0] sm:$0xff] }
  0x14   :  { %624 = vmatmul.mubr.msk.f32.gmra.mrb[8].mxu0 %vm48_vm0, %v24_v10  ;;  %v42_v28 = vld [vmem:[%s893_s1 + $0xd8] sm:$0xff]  ;;  %v43_v29 = vld [vmem:[%s893_s1 + $0xe0] sm:$0xff]  ;;  %v44_v30 = vld [vmem:[%s893_s1 + $0xe8] sm:$0xff] }
  0x15   :  { %626 = vmatprep.mubr.msk.f32.mxu0 %vm48_vm0, %v25_v11  ;;  %v45_v31 = vld [vmem:[%s893_s1 + $0xf0] sm:$0xff]  ;;  %v46_v32 = vld [vmem:[%s893_s1 + $0xf8] sm:$0xff]  ;;  %v403_v33 = vld [vmem:[%s894_s2 + $0x8] sm:$0xff] }
  0x16   :  { %468 = vmatprep.mubr.f32.mxu1 %v403_v33 }
  0x18   :  { %627 = vmatmul.mubr.msk.f32.gmra.mrb[10].mxu0 %vm48_vm0, %v26_v12 }
  0x19   :  { %629 = vmatprep.mubr.msk.f32.mxu0 %vm48_vm0, %v27_v13 }
  0x1c   :  { %630 = vmatmul.mubr.msk.f32.gmra.mrb[12].mxu0 %vm48_vm0, %v28_v14 }
  0x1d   :  { %632 = vmatprep.mubr.msk.f32.mxu0 %vm48_vm0, %v29_v15 }
  0x20   :  { %633 = vmatmul.mubr.msk.f32.gmra.mrb[14].mxu0 %vm48_vm0, %v30_v16 }
  0x21   :  { %635 = vmatprep.mubr.msk.f32.mxu0 %vm48_vm0, %v31_v17 }
  0x24   :  { %636 = vmatmul.mubr.msk.f32.gmra.mrb[16].mxu0 %vm48_vm0, %v32_v18 }
  0x25   :  { %638 = vmatprep.mubr.msk.f32.mxu0 %vm48_vm0, %v33_v19 }
  0x28   :  { %639 = vmatmul.mubr.msk.f32.gmra.mrb[18].mxu0 %vm48_vm0, %v34_v20 }
  0x29   :  { %641 = vmatprep.mubr.msk.f32.mxu0 %vm48_vm0, %v35_v21 }
  0x2c   :  { %642 = vmatmul.mubr.msk.f32.gmra.mrb[20].mxu0 %vm48_vm0, %v36_v22 }
  0x2d   :  { %644 = vmatprep.mubr.msk.f32.mxu0 %vm48_vm0, %v37_v23 }
  0x30   :  { %645 = vmatmul.mubr.msk.f32.gmra.mrb[22].mxu0 %vm48_vm0, %v38_v24 }
  0x31   :  { %647 = vmatprep.mubr.msk.f32.mxu0 %vm48_vm0, %v39_v25 }
  0x34   :  { %648 = vmatmul.mubr.msk.f32.gmra.mrb[24].mxu0 %vm48_vm0, %v40_v26 }
  0x35   :  { %650 = vmatprep.mubr.msk.f32.mxu0 %vm48_vm0, %v41_v27 }
  0x38   :  { %651 = vmatmul.mubr.msk.f32.gmra.mrb[26].mxu0 %vm48_vm0, %v42_v28 }
  0x39   :  { %653 = vmatprep.mubr.msk.f32.mxu0 %vm48_vm0, %v43_v29 }
  0x3c   :  { %654 = vmatmul.mubr.msk.f32.gmra.mrb[28].mxu0 %vm48_vm0, %v44_v30 }
  0x3d   :  { %656 = vmatprep.mubr.msk.f32.mxu0 %vm48_vm0, %v45_v31 }
  0x40   :  { %657 = vmatmul.mubr.msk.f32.gmra.mrb[30].mxu0 %vm48_vm0, %v46_v32 }
  0xd7   :  { %v613_v34 = vpop.f32.mrb[0].mxu0 }
  0xd8   :  { %v371_v35 = vmax.f32 %v613_v34, 0.0  ;;  %v211_v36 = vpop.f32.mrb[1].mxu0 }
  0xd9   :  { %v370_v37 = vmax.f32 %v211_v36, 0.0 }
  0xdb   :  { %v616_v38 = vpop.f32.mrb[2].mxu0  ;;  %v661_v39 = vpack.c.bf16 %v371_v35, %v370_v37 }
  0xdc   :  { %v373_v40 = vmax.f32 %v616_v38, 0.0  ;;  %v221_v41 = vpop.f32.mrb[3].mxu0 }
  0xdd   :  { %v372_v42 = vmax.f32 %v221_v41, 0.0 }
  0xdf   :  { %v665_v43 = vpack.c.bf16 %v373_v40, %v372_v42  ;;  %v619_v44 = vpop.f32.mrb[4].mxu0 }
  0xe0   :  { %v375_v45 = vmax.f32 %v619_v44, 0.0  ;;  %v231_v46 = vpop.f32.mrb[5].mxu0 }
  0xe1   :  { %v374_v47 = vmax.f32 %v231_v46, 0.0 }
  0xe3   :  { %v669_v48 = vpack.c.bf16 %v375_v45, %v374_v47  ;;  %v622_v49 = vpop.f32.mrb[6].mxu0 }
  0xe4   :  { %v377_v50 = vmax.f32 %v622_v49, 0.0  ;;  %v241_v51 = vpop.f32.mrb[7].mxu0 }
  0xe5   :  { %v376_v52 = vmax.f32 %v241_v51, 0.0 }
  0xe7   :  { %v673_v53 = vpack.c.bf16 %v377_v50, %v376_v52  ;;  %v625_v54 = vpop.f32.mrb[8].mxu0  ;;  %v402_v50 = vld [vmem:[%s894_s2] sm:$0xff]  ;;  %s722_s2 = smov [#allocation2]  }
  0xe8   :  { %v379_v55 = vmax.f32 %v625_v54, 0.0  ;;  %v251_v56 = vpop.f32.mrb[9].mxu0  ;;  %s501_s24 = sshll.u32 %s722_s2, 4  ;;  %s502_s24 = int_to_ptr.vmem [resolvable:$true] %s501_s24 }
  0xe9   :  { %v378_v57 = vmax.f32 %v251_v56, 0.0  ;;  %s698_s25 = scalar_lea.vmem %s502_s24, 128  ;;  %p703_p1 = scmp.lt.s32.totalorder %s502_s24, %s502_s24 }
  0xea   :  { %p699_p0 = scmp.ne.s32.totalorder %s502_s24, %s698_s25  ;;  %p704_p2 = scmp.lt.s32.totalorder %s698_s25, %s698_s25 }
  0xeb   :  { %v677_v58 = vpack.c.bf16 %v379_v55, %v378_v57  ;;  %v628_v59 = vpop.f32.mrb[10].mxu0 }
  0xec   :  { %v381_v60 = vmax.f32 %v628_v59, 0.0  ;;  %v261_v61 = vpop.f32.mrb[11].mxu0  ;;  %v474_v59 = vlaneseq  ;;  %p705_p3 = por %p704_p2, %p703_p1 }
  0xed   :  { %v380_v62 = vmax.f32 %v261_v61, 0.0 }
  0xee   :  { %p706_p4 = pnand %p705_p3, %p699_p0 }
  0xef   :  { %v681_v63 = vpack.c.bf16 %v381_v60, %v380_v62  ;;  %v631_v0 = vpop.f32.mrb[12].mxu0 }
  0xf0   :  { %v383_v1 = vmax.f32 %v631_v0, 0.0  ;;  %v271_v2 = vpop.f32.mrb[13].mxu0 }
  0xf1   :  { %v382_v3 = vmax.f32 %v271_v2, 0.0 }
  0xf3   :  { %v685_v4 = vpack.c.bf16 %v383_v1, %v382_v3  ;;  %v634_v5 = vpop.f32.mrb[14].mxu0 }
  0xf4   :  { %v385_v6 = vmax.f32 %v634_v5, 0.0  ;;  %v281_v7 = vpop.f32.mrb[15].mxu0 }
  0xf5   :  { %v384_v8 = vmax.f32 %v281_v7, 0.0 }
  0xf7   :  { %v689_v9 = vpack.c.bf16 %v385_v6, %v384_v8  ;;  %v637_v10 = vpop.f32.mrb[16].mxu0 }
  0xf8   :  { %v387_v11 = vmax.f32 %v637_v10, 0.0  ;;  %v291_v12 = vpop.f32.mrb[17].mxu0 }
  0xf9   :  { %v386_v13 = vmax.f32 %v291_v12, 0.0 }
  0xfb   :  { %v640_v14 = vpop.f32.mrb[18].mxu0  ;;  %v659_v15 = vpack.c.bf16 %v387_v11, %v386_v13 }
  0xfc   :  { %v389_v16 = vmax.f32 %v640_v14, 0.0  ;;  %v301_v17 = vpop.f32.mrb[19].mxu0 }
  0xfd   :  { %v388_v18 = vmax.f32 %v301_v17, 0.0  ;;  %660 = vmatprep.subr.bf16.mxu1 %v659_v15 }
  0xfe   :  { %662 = vmatpush3.bf16.msra.mxu1 %v661_v39 }
  0xff   :  { %v663_v19 = vpack.c.bf16 %v389_v16, %v388_v18  ;;  %v643_v20 = vpop.f32.mrb[20].mxu0 }
 0x100   :  { %v391_v21 = vmax.f32 %v643_v20, 0.0  ;;  %v311_v22 = vpop.f32.mrb[21].mxu0 }
 0x101   :  { %v390_v23 = vmax.f32 %v311_v22, 0.0  ;;  %664 = vmatprep.subr.bf16.mxu1 %v663_v19 }
 0x102   :  { %666 = vmatpush3.bf16.msra.mxu1 %v665_v43 }
 0x103   :  { %v667_v24 = vpack.c.bf16 %v391_v21, %v390_v23  ;;  %v646_v25 = vpop.f32.mrb[22].mxu0 }
 0x104   :  { %v393_v26 = vmax.f32 %v646_v25, 0.0  ;;  %v321_v27 = vpop.f32.mrb[23].mxu0 }
 0x105   :  { %v392_v28 = vmax.f32 %v321_v27, 0.0  ;;  %668 = vmatprep.subr.bf16.mxu1 %v667_v24 }
 0x106   :  { %670 = vmatpush3.bf16.msra.mxu1 %v669_v48 }
 0x107   :  { %v671_v29 = vpack.c.bf16 %v393_v26, %v392_v28  ;;  %v649_v30 = vpop.f32.mrb[24].mxu0 }
 0x108   :  { %v395_v31 = vmax.f32 %v649_v30, 0.0  ;;  %v331_v32 = vpop.f32.mrb[25].mxu0 }
 0x109   :  { %v394_v33 = vmax.f32 %v331_v32, 0.0  ;;  %672 = vmatprep.subr.bf16.mxu1 %v671_v29 }
 0x10a   :  { %674 = vmatpush3.bf16.msra.mxu1 %v673_v53 }
 0x10b   :  { %v675_v34 = vpack.c.bf16 %v395_v31, %v394_v33  ;;  %v652_v35 = vpop.f32.mrb[26].mxu0 }
 0x10c   :  { %v397_v36 = vmax.f32 %v652_v35, 0.0  ;;  %v341_v37 = vpop.f32.mrb[27].mxu0 }
 0x10d   :  { %v396_v38 = vmax.f32 %v341_v37, 0.0  ;;  %676 = vmatprep.subr.bf16.mxu1 %v675_v34 }
 0x10e   :  { %678 = vmatpush3.bf16.msra.mxu1 %v677_v58 }
 0x10f   :  { %v679_v39 = vpack.c.bf16 %v397_v36, %v396_v38  ;;  %v655_v40 = vpop.f32.mrb[28].mxu0 }
 0x110   :  { %v399_v41 = vmax.f32 %v655_v40, 0.0  ;;  %v351_v42 = vpop.f32.mrb[29].mxu0 }
 0x111   :  { %v398_v43 = vmax.f32 %v351_v42, 0.0  ;;  %680 = vmatprep.subr.bf16.mxu1 %v679_v39 }
 0x112   :  { %682 = vmatpush3.bf16.msra.mxu1 %v681_v63  ;;  %v475_v63 = vshrl.u32 %v474_v59, 7 }
 0x113   :  { %v683_v44 = vpack.c.bf16 %v399_v41, %v398_v43  ;;  %v658_v45 = vpop.f32.mrb[30].mxu0 }
 0x114   :  { %v401_v46 = vmax.f32 %v658_v45, 0.0  ;;  %v361_v47 = vpop.f32.mrb[31].mxu0  ;;  %vm476_vm3 = vcmp.lt.s32.totalorder %v475_v63, 1 }
 0x115   :  { %v400_v48 = vmax.f32 %v361_v47, 0.0  ;;  %684 = vmatprep.subr.bf16.mxu1 %v683_v44 }
 0x116   :  { %686 = vmatpush3.bf16.msra.mxu1 %v685_v4 }
 0x117   :  { %v687_v49 = vpack.c.bf16 %v401_v46, %v400_v48 }
 0x119   :  { %688 = vmatprep.subr.bf16.mxu1 %v687_v49 }
 0x11a   :  { %690 = vmatpush3.bf16.msra.mxu1 %v689_v9 }
 0x11d   :  { %469 = vmatmul.mubr.f32.vlgmr.msra.gmra.mrb[0].mxu1 %v402_v50 }
 0x1f0   :  { %v606_v51 = vpop.f32.mrb[0].mxu1 }
 0x1f1   :  { %v607_v52 = vpop.f32.mrb[1].mxu1 }
 0x1f2   :  { %v608_v53 = vadd.f32 %v607_v52, %v606_v51 }
 0x1f4   :  { %v479_v54 = vmin.f32 %v608_v53, 20.0  ;;  %vm478_vm2 = vcmp.gt.f32.partialorder %v608_v53, 20.0 }
 0x1f6   :  { %v480_v55 = vmul.f32 1.442695, %v479_v54 }
 0x1f8   :  { %692 = vpow2.f32 %v480_v55 }
 0x202   :  { %v693_v56 = vpop.eup %692 }
 0x203   :  { %v482_v57 = vadd.f32 1.0, %v693_v56  ;;  %v485_v58 = vmul.f32 -0.5, %v693_v56  ;;  %v488_v61 = vand.u32 2147483647, %v693_v56 }
 0x205   :  { %694 = vlog2.f32 %v482_v57  ;;  %v486_v60 = vadd.f32 1.0, %v485_v58  ;;  %vm489_vm1 = vcmp.lt.f32.partialorder %v488_v61, 0.0004427343 }
 0x206   :  { %696 = vtanh.f32 %v608_v53 }
 0x207   :  { %v487_v1 = vmul.f32 %v693_v56, %v486_v60 }
 0x20f   :  { %v695_v62 = vpop.eup %694 }
 0x210   :  { %v484_v0 = vmul.f32 0.6931472, %v695_v62  ;;  %v697_v5 = vpop.eup %696 }
 0x212   :  { %v490_v2 = vsel %vm489_vm1, %v487_v1, %v484_v0 }
 0x213   :  { %v491_v3 = vsel %vm478_vm2, %v608_v53, %v490_v2 }
 0x214   :  { %v492_v4 = vadd.f32 1e-08, %v491_v3 }
 0x216   :  { %v493_v6 = vsel %vm476_vm3, %v697_v5, %v492_v4 }
 0x217   :  { %494 = vst [vmem:[#allocation2] sm:$0xff] %v493_v6 }
 0x218   :  { %709 = shalt.err (!%p706_p4)
}
 0x219   :  { %s710_s28 = scalar_lea.hbm %s895_s3, 128 }
 0x21a   :  { %p711_p5 = scmp.ne.s32.totalorder %s895_s3, %s710_s28  ;;  %p714_p6 = scmp.lt.u32.totalorder %s710_s28, %s895_s3 }
 0x21c   :  { %p716_p7 = pnand %p714_p6, %p711_p5 }
 0x21e   :  { %719 = shalt.err (!%p716_p7)
}
 0x21f   :  { %504 = dma.vmem_to_hbm [thread:$0]  %s502_s24, 128, %s895_s3, [#allocation3]  }
 0x220   :  { %720 = dma.done.wait [#allocation3], 128  }
 0x221   :  { %721 = vsyncadd [#allocation3], 4294967168 }
 0x222   :  { %508 = vsyncpa [#allocation3], 1 }

</bundles_post_ra>
